<compile_context>
chip_gen: v5e
topology: v5e:2x2
jax: 0.10.0
libtpu: 0.0.40
codegen_flags: <defaults>
</compile_context>

<pallas_src>
import functools

import jax
import jax.numpy as jnp
from jax.experimental import pallas as pl
from jax.experimental.pallas import tpu as pltpu


def _round_up(n, m):
    return ((n + m - 1) // m) * m


def _cdiv(a, b):
    return (a + b - 1) // b


# Tile-sizing budget and scoped-VMEM request.  Chosen to stay well inside
# v7x's 64 MiB/TC physical VMEM; v5e/v6e (128 MiB) have ample headroom.
_VMEM_TILE_BUDGET = 40 * 1024 * 1024
_VMEM_LIMIT_BYTES = 48 * 1024 * 1024


def _linear_kernel(x_ref, w_ref, b_ref, o_ref, *, compute_dtype):
    # Collapsed-K kernel: one (tm, K) x (K, tn) MXU matmul per grid step,
    # f32 accumulation, bias added once in f32, single down-cast store.
    x = x_ref[...]
    w = w_ref[...]
    if compute_dtype is not None:
        x = x.astype(compute_dtype)
        w = w.astype(compute_dtype)
    acc = jnp.dot(x, w, preferred_element_type=jnp.float32)
    o_ref[...] = (acc + b_ref[...].astype(jnp.float32)).astype(o_ref.dtype)


def _linear_kernel_ktiled(x_ref, w_ref, b_ref, o_ref, acc_ref, *, compute_dtype):
    # Fallback for very large in_dim: K is tiled (last grid axis, "arbitrary"),
    # f32 accumulator resident across the K axis.
    k = pl.program_id(2)

    @pl.when(k == 0)
    def _init():
        acc_ref[...] = jnp.zeros_like(acc_ref)

    x = x_ref[...]
    w = w_ref[...]
    if compute_dtype is not None:
        x = x.astype(compute_dtype)
        w = w.astype(compute_dtype)
    acc_ref[...] += jnp.dot(x, w, preferred_element_type=jnp.float32)

    @pl.when(k == pl.num_programs(2) - 1)
    def _finalize():
        o_ref[...] = (acc_ref[...] + b_ref[...].astype(jnp.float32)).astype(o_ref.dtype)


def linear_classifier(x, weight, bias, *, compute_dtype=None, tm_max=512):
    """y = x @ weight.T + bias.   weight: (out_dim, in_dim), bias: (out_dim,)."""
    B, K = x.shape
    N, K2 = weight.shape
    assert K == K2, "in_dim mismatch"
    assert bias.shape == (N,)

    # Weight path: transpose once to (K, N); pad only the tiny N axis so the
    # output stays lane-dense (multiple of 128).  x is NOT padded.
    Np = _round_up(N, 128)
    w_t = jnp.transpose(weight)                      # (K, N)
    if Np != N:
        w_t = jnp.pad(w_t, ((0, 0), (0, Np - N)))
        bias_p = jnp.pad(bias, (0, Np - N))
    else:
        bias_p = bias
    b2d = bias_p.reshape(1, Np)

    # ---- tile selection -------------------------------------------------
    tn = 256 if (Np % 256 == 0) else 128             # divides Np, MXU aligned
    itemsize = jnp.dtype(x.dtype).itemsize

    def fits(tm_, tk_):
        # double-buffered x & w tiles + double-buffered out tile + bias
        return (2 * (tm_ * tk_ + tk_ * tn) * itemsize
                + 2 * tm_ * tn * itemsize
                + tn * 4) <= _VMEM_TILE_BUDGET

    tm = min(tm_max, _round_up(B, 8))
    while tm > 8 and not fits(tm, K):
        tm = max(8, _round_up(tm // 2, 8))
    collapse_k = fits(tm, K)

    if collapse_k:
        # Keep >= 2 parallel blocks for the v7x megacore when batch allows.
        if _cdiv(B, tm) * (Np // tn) < 2 and B >= 16:
            tm = max(8, _round_up(_cdiv(B, 2), 8))

        grid = (_cdiv(B, tm), Np // tn)              # no K axis, no pad of x
        kernel = functools.partial(_linear_kernel, compute_dtype=compute_dtype)
        out = pl.pallas_call(
            kernel,
            out_shape=jax.ShapeDtypeStruct((B, Np), x.dtype),
            grid_spec=pltpu.PrefetchScalarGridSpec(
                num_scalar_prefetch=0,
                grid=grid,
                in_specs=[
                    pl.BlockSpec((tm, K), lambda i, j: (i, 0)),   # x tile, full K
                    pl.BlockSpec((K, tn), lambda i, j: (0, j)),   # (K, N) weight tile
                    pl.BlockSpec((1, tn), lambda i, j: (0, j)),   # bias tile
                ],
                out_specs=pl.BlockSpec((tm, tn), lambda i, j: (i, j)),
            ),
            compiler_params=pltpu.CompilerParams(
                dimension_semantics=("parallel", "parallel"),
                vmem_limit_bytes=_VMEM_LIMIT_BYTES,
            ),
        )(x, w_t, b2d)
    else:
        # Very large in_dim: tile K.  The contraction dim must be zero-padded
        # (OOB along K would corrupt the reduction); B/N stay un-padded.
        tk = 1024
        Kp = _round_up(K, tk)
        tm = min(tm_max, _round_up(B, 8))
        while tm > 8 and not fits(tm, tk):
            tm = max(8, _round_up(tm // 2, 8))
        x_k = jnp.pad(x, ((0, 0), (0, Kp - K))) if Kp != K else x
        w_k = jnp.pad(w_t, ((0, Kp - K), (0, 0))) if Kp != K else w_t
        grid = (_cdiv(B, tm), Np // tn, Kp // tk)
        kernel = functools.partial(_linear_kernel_ktiled, compute_dtype=compute_dtype)
        out = pl.pallas_call(
            kernel,
            out_shape=jax.ShapeDtypeStruct((B, Np), x.dtype),
            grid_spec=pltpu.PrefetchScalarGridSpec(
                num_scalar_prefetch=0,
                grid=grid,
                in_specs=[
                    pl.BlockSpec((tm, tk), lambda i, j, k: (i, k)),
                    pl.BlockSpec((tk, tn), lambda i, j, k: (k, j)),
                    pl.BlockSpec((1, tn), lambda i, j, k: (0, j)),
                ],
                out_specs=pl.BlockSpec((tm, tn), lambda i, j, k: (i, j)),
                scratch_shapes=[pltpu.VMEM((tm, tn), jnp.float32)],
            ),
            compiler_params=pltpu.CompilerParams(
                dimension_semantics=("parallel", "parallel", "arbitrary"),
                vmem_limit_bytes=_VMEM_LIMIT_BYTES,
            ),
        )(x_k, w_k, b2d)

    return out[:, :N] if Np != N else out


if __name__ == "__main__":
    key = jax.random.PRNGKey(0)

    def make_case(k, batch, in_dim, out_dim):
        kx, kw, kb = jax.random.split(k, 3)
        bound = 1.0 / (in_dim ** 0.5)   # PyTorch nn.Linear init range
        x = jax.random.normal(kx, (batch, in_dim), dtype=jnp.float32)
        w = jax.random.uniform(kw, (out_dim, in_dim), minval=-bound, maxval=bound,
                               dtype=jnp.float32)
        b = jax.random.uniform(kb, (out_dim,), minval=-bound, maxval=bound,
                               dtype=jnp.float32)
        return x, w, b

    k1, k2 = jax.random.split(key)

    # Case 1: small classifier head (lane-padding path, single block).
    x, w, b = make_case(k1, batch=8, in_dim=32, out_dim=16)
    y = jax.block_until_ready(linear_classifier(x, w, b))
    y_ref = x @ w.T + b
    assert y.shape == (8, 16)
    assert jnp.allclose(y, y_ref, atol=1e-5, rtol=1e-5), "case1 mismatch vs reference"

    # Case 2: multi-block parallel grid (ragged batch/N, collapsed K).
    x2, w2, b2 = make_case(k2, batch=256, in_dim=384, out_dim=160)
    y2 = jax.block_until_ready(linear_classifier(x2, w2, b2))
    y2_ref = x2 @ w2.T + b2
    assert y2.shape == (256, 160)
    assert jnp.allclose(y2, y2_ref, atol=1e-4, rtol=1e-4), "case2 mismatch vs reference"

    # Case 3: bf16 MXU path (f32 accumulation), loose tolerance vs f32 ref.
    y3 = jax.block_until_ready(
        linear_classifier(x2, w2, b2, compute_dtype=jnp.bfloat16))
    assert y3.shape == (256, 160)
    assert jnp.allclose(y3, y2_ref, atol=5e-2, rtol=5e-2), "case3 mismatch vs reference"

    print("KERNEL_OK")
</pallas_src>

<mosaic_0001>
module attributes {stable_mosaic.version = 11 : i64} {
  func.func @_linear_kernel(%arg0: i32, %arg1: i32, %arg2: memref<8x32xf32, #tpu.memory_space<vmem>>, %arg3: memref<32x128xf32, #tpu.memory_space<vmem>>, %arg4: memref<1x128xf32, #tpu.memory_space<vmem>>, %arg5: memref<8x128xf32, #tpu.memory_space<vmem>>) attributes {dimension_semantics = [#tpu.dimension_semantics<parallel>, #tpu.dimension_semantics<parallel>], iteration_bounds = array<i64: 1, 1>, scalar_prefetch = 0 : i64, scratch_operands = 0 : i64, tpu.core_type = #tpu.core_type<tc>, window_params = [{transform_indices = @transform_0, window_bounds = array<i64: 8, 32>}, {transform_indices = @transform_1, window_bounds = array<i64: 32, 128>}, {transform_indices = @transform_2, window_bounds = array<i64: 1, 128>}, {transform_indices = @transform_3, window_bounds = array<i64: 8, 128>}]} {
    %c0 = arith.constant 0 : index
    %c0_0 = arith.constant 0 : index
    %0 = vector.load %arg2[%c0, %c0_0] : memref<8x32xf32, #tpu.memory_space<vmem>>, vector<8x32xf32>
    %c0_1 = arith.constant 0 : index
    %c0_2 = arith.constant 0 : index
    %1 = vector.load %arg3[%c0_1, %c0_2] : memref<32x128xf32, #tpu.memory_space<vmem>>, vector<32x128xf32>
    %cst = arith.constant dense<0.000000e+00> : vector<8x128xf32>
    %2 = tpu.matmul %0, %1, %cst {dimension_numbers = #tpu.dot_dimension_numbers<[1], [0], [0], [1], [0, 0, 1, 1], [], []>} : vector<8x32xf32>, vector<32x128xf32>, vector<8x128xf32> -> vector<8x128xf32>
    %c0_3 = arith.constant 0 : index
    %c0_4 = arith.constant 0 : index
    %3 = vector.load %arg4[%c0_3, %c0_4] : memref<1x128xf32, #tpu.memory_space<vmem>>, vector<1x128xf32>
    %4 = vector.broadcast %3 : vector<1x128xf32> to vector<8x128xf32>
    %5 = arith.addf %2, %4 : vector<8x128xf32>
    %c0_5 = arith.constant 0 : index
    %c0_6 = arith.constant 0 : index
    %6 = vector.load %arg5[%c0_5, %c0_6] : memref<8x128xf32, #tpu.memory_space<vmem>>, vector<8x128xf32>
    tpu.vector_store %arg5[%c0_5, %c0_6], %5 {strides = array<i32>} : memref<8x128xf32, #tpu.memory_space<vmem>>, vector<8x128xf32>,
    return
  }
  func.func @transform_0(%arg0: i32, %arg1: i32) -> (i32, i32) {
    %c0_i32 = arith.constant 0 : i32
    %c0_i32_0 = arith.constant 0 : i32
    return %arg0, %c0_i32 : i32, i32
  }
  func.func @transform_1(%arg0: i32, %arg1: i32) -> (i32, i32) {
    %c0_i32 = arith.constant 0 : i32
    %c0_i32_0 = arith.constant 0 : i32
    return %c0_i32, %arg1 : i32, i32
  }
  func.func @transform_2(%arg0: i32, %arg1: i32) -> (i32, i32) {
    %c0_i32 = arith.constant 0 : i32
    %c0_i32_0 = arith.constant 0 : i32
    return %c0_i32, %arg1 : i32, i32
  }
  func.func @transform_3(%arg0: i32, %arg1: i32) -> (i32, i32) {
    %c0_i32 = arith.constant 0 : i32
    return %arg0, %arg1 : i32, i32
  }
}

</mosaic_0001>

<bundles_post_ra>
// kernel: tpu_custom_call.1
= control target key start
LH: loop header
LB: loop body
LE: loop exit
PB: predicated region body
PF: predicated region fallthrough
CT: control target
= control target key end

     0   :  { %8 = vsyncpa [#allocation3], 0  ;;  %s219_s0 = inlined_call_operand.hbm [shape: f32[8,32], index: 0, kind: input, shape index: {}]   ;;  %s220_s1 = inlined_call_operand.hbm [shape: f32[32,128], index: 1, kind: input, shape index: {}]   ;;  %s221_s2 = inlined_call_operand.vmem [shape: f32[1,128], index: 2, kind: input, shape index: {}]   ;;  %s222_s3 = inlined_call_operand.hbm [shape: f32[8,128], index: 3, kind: output, shape index: {}]  }
   0x1   :  { %9 = vsyncpa [#allocation6], 0 }
   0x2   :  { %10 = vsyncpa [#allocation4], 0  ;;  %s16_s14 = sshll.u32 %s219_s0, 4  ;;  %s182_s15 = smov [#allocation2]   ;;  %s17_s14 = int_to_ptr.hbm [resolvable:$true] %s16_s14 }
   0x3   :  { %s18_s16 = sshll.u32 %s182_s15, 4  ;;  %s26_s19 = sshll.u32 %s220_s1, 4  ;;  %s19_s16 = int_to_ptr.vmem [resolvable:$true] %s18_s16  ;;  %s27_s19 = int_to_ptr.hbm [resolvable:$true] %s26_s19 }
   0x4   :  { %21 = dma.hbm_to_vmem [thread:$0]  %s17_s14, 128, %s19_s16, [#allocation3]  }
   0x5   :  { %s183_s20 = smov [#allocation5]   ;;  %s184_s22 = smov 128  }
   0x6   :  { %s28_s21 = sshll.u32 %s183_s20, 4  ;;  %s185_s23 = smov 8   ;;  %s29_s21 = int_to_ptr.vmem [resolvable:$true] %s28_s21 }
   0x7   :  { %34 = dma.hbm_to_vmem [thread:$0]  %s27_s19, 512, %s29_s21, [#allocation6], %s184_s22, %s184_s22, %s185_s23  }
   0x8   :  { %176 = dma.done.wait [#allocation3], 128  }
   0x9   :  { %177 = vsyncadd [#allocation3], 4294967168 }
   0xa   :  { %178 = dma.done.wait [#allocation6], 512  }
   0xb   :  { %179 = vsyncadd [#allocation6], 4294966784  ;;  %v49_v0 = vld [vmem:[#allocation5 + $0x18] sm:$0xff]  ;;  %v48_v1 = vld [vmem:[#allocation5 + $0x10] sm:$0xff]  ;;  %vm54_vm0 = vcmask 261120   ;;  %s186_s24 = smov [#allocation7]  }
   0xc   :  { %70 = vmatpush.msra.mxu0 %v49_v0  ;;  %v47_v2 = vld [vmem:[#allocation5 + $0x8] sm:$0xff]  ;;  %v46_v3 = vld [vmem:[#allocation5] sm:$0xff]  ;;  %v45_v4 = vld [vmem:[#allocation2] sm:$0xff]  ;;  %s84_s25 = sshll.u32 %s186_s24, 4  ;;  %s86_s28 = sshll.u32 %s222_s3, 4  ;;  %s85_s25 = int_to_ptr.vmem [resolvable:$true] %s84_s25  ;;  %s87_s28 = int_to_ptr.hbm [resolvable:$true] %s86_s28 }
   0xd   :  { %v103_v5 = vld [vmem:[%s221_s2] ss:$0 sm:$0xff] }
   0xe   :  { %71 = vmatpush.msra.mxu0 %v48_v1 }
  0x10   :  { %72 = vmatpush.msra.mxu0 %v47_v2 }
  0x12   :  { %73 = vmatpush.msra.mxu0 %v46_v3 }
  0x13   :  { %97 = vmatmul.msk.f32.vlgmr.msra.gmra.mxu0 %vm54_vm0, %v45_v4 }
  0x90   :  { %v75_v6 = vpop.f32.mrf.mxu0 }
  0x91   :  { %v76_v7 = vadd.f32 %v103_v5, %v75_v6 }
  0x93   :  { %78 = vst [vmem:[#allocation7] sm:$0xff] %v76_v7 }
  0x94   :  { %89 = dma.vmem_to_hbm [thread:$0]  %s85_s25, 128, %s87_s28, [#allocation4]  }
  0x95   :  { %180 = dma.done.wait [#allocation4], 128  }
  0x96   :  { %181 = vsyncadd [#allocation4], 4294967168 }
  0x97   :  { %94 = vsyncpa [#allocation3], 1 }
  0x98   :  { %95 = vsyncpa [#allocation6], 1 }
  0x99   :  { %96 = vsyncpa [#allocation4], 1 }

</bundles_post_ra>
